<compile_context>
chip_gen: v5e
topology: v5e:2x2
jax: 0.10.0
libtpu: 0.0.40
codegen_flags: <defaults>
</compile_context>

<pallas_src>
import functools

import numpy as np
import jax
import jax.numpy as jnp
from jax.experimental import pallas as pl
from jax.experimental.pallas import tpu as pltpu


def _downsample_a_kernel(x_ref, s_ref, o_ref, *, nb, cin, cout, hw, p, mode):
    """x_ref: (nb, cin*hw); s_ref: (hw, p) 0/1 selector; o_ref: (nb, cout*p)."""
    s = s_ref[...]  # resident selector tile, loaded once per grid step
    for c in range(cin):  # static unroll (cin is small in CIFAR ResNets)
        v = x_ref[:, c * hw:(c + 1) * hw]  # (nb, hw), 128-aligned lane slice
        if mode == "f32_exact":
            # Exact 3-way split of f32 into bf16 chunks (hi+mid+lo == v exactly,
            # each chunk exactly representable in bf16), then three 1-pass bf16
            # MXU matmuls with f32 accumulation.  Selector entries are 0/1, so
            # every partial product and the final sum are exact.
            hi = v.astype(jnp.bfloat16)
            r = v - hi.astype(jnp.float32)
            mid = r.astype(jnp.bfloat16)
            lo = (r - mid.astype(jnp.float32)).astype(jnp.bfloat16)
            y = (jnp.dot(hi, s, preferred_element_type=jnp.float32)
                 + jnp.dot(mid, s, preferred_element_type=jnp.float32)
                 + jnp.dot(lo, s, preferred_element_type=jnp.float32))
        else:
            # bf16 (or other) inputs: a single 1-pass matmul is already exact
            # for a 0/1 selector with one 1 per output column.
            y = jnp.dot(v, s, preferred_element_type=jnp.float32)
        o_ref[:, c * p:(c + 1) * p] = y.astype(o_ref.dtype)
    if cout > cin:
        # Zero-pad the extra channels, written exactly once (no re-write).
        o_ref[:, cin * p:cout * p] = jnp.zeros((nb, (cout - cin) * p), o_ref.dtype)


def downsample_a(x, n_out):
    """x: (N, C, H, W) array (NCHW, like PyTorch). Returns (N, n_out, Ho, Wo)."""
    n, cin, h, w = x.shape
    assert n_out >= cin, "DownsampleA only zero-pads channels (nOut >= nIn)"
    # AvgPool2d(kernel_size=1, stride=2) output spatial size (floor mode):
    ho = (h - 1) // 2 + 1
    wo = (w - 1) // 2 + 1
    hw, p = h * w, ho * wo

    # Free, contiguous reshape — no transpose, no extra HBM pass.
    x2d = x.reshape(n, cin * hw)

    # Host-side numpy 0/1 selector (compile-time constant):
    #   S[2*i*W + 2*j, i*Wo + j] = 1   (handles odd H/W too).
    rows = (2 * w * np.arange(ho)[:, None] + 2 * np.arange(wo)[None, :]).reshape(-1)
    sel_np = np.zeros((hw, p), dtype=np.float32)
    sel_np[rows, np.arange(p)] = 1.0

    if x.dtype == jnp.float32:
        sel = jnp.asarray(sel_np, dtype=jnp.bfloat16)  # 0/1 is exact in bf16
        mode = "f32_exact"
    else:
        sel = jnp.asarray(sel_np, dtype=x.dtype)
        mode = "direct"

    # Batch blocking: big enough to amortize per-step overhead, small enough to
    # fit every generation's default scoped-VMEM budget for all CIFAR stages
    # (worst case ~13 MiB with double buffering at nb=64).  nb is either == n
    # or a multiple of 8, so the (8,128) block constraint always holds.
    nb = min(n, 64)
    grid = (pl.cdiv(n, nb),)

    kernel = functools.partial(
        _downsample_a_kernel, nb=nb, cin=cin, cout=n_out, hw=hw, p=p, mode=mode
    )

    out_flat = pl.pallas_call(
        kernel,
        out_shape=jax.ShapeDtypeStruct((n, n_out * p), x.dtype),
        grid=grid,
        in_specs=[
            pl.BlockSpec((nb, cin * hw), lambda i: (i, 0)),
            # Same block index every step -> selector stays resident in VMEM.
            pl.BlockSpec((hw, p), lambda i: (0, 0)),
        ],
        out_specs=pl.BlockSpec((nb, n_out * p), lambda i: (i, 0)),
        compiler_params=pltpu.CompilerParams(
            dimension_semantics=("parallel",),
            vmem_limit_bytes=32 * 1024 * 1024,
        ),
    )(x2d, sel)

    # Free, contiguous reshape back to NCHW output layout.
    return out_flat.reshape(n, n_out, ho, wo)


if __name__ == "__main__":
    # Module config: DownsampleA(nIn=4, nOut=8, stride=2) — no learned params.
    n_in, n_out, stride = 4, 8, 2
    assert stride == 2

    key = jax.random.PRNGKey(0)
    x = jax.random.normal(key, (2, n_in, 16, 16), dtype=jnp.float32)

    y = downsample_a(x, n_out)
    y = jax.block_until_ready(y)

    # Reference in plain JAX (exact PyTorch semantics).
    sub = x[:, :, ::2, ::2]
    ref = jnp.concatenate(
        [sub, jnp.zeros((x.shape[0], n_out - n_in) + sub.shape[2:], x.dtype)],
        axis=1,
    )

    assert y.shape == (2, n_out, 8, 8), y.shape
    assert y.dtype == x.dtype
    assert jnp.allclose(y, ref, rtol=1e-6, atol=1e-6), "mismatch vs reference"

    print("KERNEL_OK")
</pallas_src>

<mosaic_0001>
module attributes {stable_mosaic.version = 11 : i64} {
  func.func @_downsample_a_kernel(%arg0: i32, %arg1: memref<2x1024xf32, #tpu.memory_space<vmem>>, %arg2: memref<256x64xbf16, #tpu.memory_space<vmem>>, %arg3: memref<2x512xf32, #tpu.memory_space<vmem>>) attributes {dimension_semantics = [#tpu.dimension_semantics<parallel>], iteration_bounds = array<i64: 1>, scalar_prefetch = 0 : i64, scratch_operands = 0 : i64, tpu.core_type = #tpu.core_type<tc>, window_params = [{transform_indices = @transform_0, window_bounds = array<i64: 2, 1024>}, {pipeline_mode = #tpu.pipeline_mode<synchronous>, transform_indices = @transform_1, window_bounds = array<i64: 256, 64>}, {transform_indices = @transform_2, window_bounds = array<i64: 2, 512>}]} {
    %c0 = arith.constant 0 : index
    %c0_0 = arith.constant 0 : index
    %0 = vector.load %arg2[%c0, %c0_0] : memref<256x64xbf16, #tpu.memory_space<vmem>>, vector<256x64xbf16>
    %c0_1 = arith.constant 0 : index
    %c0_2 = arith.constant 0 : index
    %1 = vector.load %arg1[%c0_1, %c0_2] : memref<2x1024xf32, #tpu.memory_space<vmem>>, vector<2x256xf32>
    %2 = arith.truncf %1 : vector<2x256xf32> to vector<2x256xbf16>
    %3 = arith.extf %2 : vector<2x256xbf16> to vector<2x256xf32>
    %4 = arith.subf %1, %3 : vector<2x256xf32>
    %5 = arith.truncf %4 : vector<2x256xf32> to vector<2x256xbf16>
    %6 = arith.extf %5 : vector<2x256xbf16> to vector<2x256xf32>
    %7 = arith.subf %4, %6 : vector<2x256xf32>
    %8 = arith.truncf %7 : vector<2x256xf32> to vector<2x256xbf16>
    %cst = arith.constant dense<0.000000e+00> : vector<2x64xf32>
    %9 = tpu.matmul %2, %0, %cst {dimension_numbers = #tpu.dot_dimension_numbers<[1], [0], [0], [1], [0, 0, 1, 1], [], []>} : vector<2x256xbf16>, vector<256x64xbf16>, vector<2x64xf32> -> vector<2x64xf32>
    %cst_3 = arith.constant dense<0.000000e+00> : vector<2x64xf32>
    %10 = tpu.matmul %5, %0, %cst_3 {dimension_numbers = #tpu.dot_dimension_numbers<[1], [0], [0], [1], [0, 0, 1, 1], [], []>} : vector<2x256xbf16>, vector<256x64xbf16>, vector<2x64xf32> -> vector<2x64xf32>
    %11 = arith.addf %9, %10 : vector<2x64xf32>
    %cst_4 = arith.constant dense<0.000000e+00> : vector<2x64xf32>
    %12 = tpu.matmul %8, %0, %cst_4 {dimension_numbers = #tpu.dot_dimension_numbers<[1], [0], [0], [1], [0, 0, 1, 1], [], []>} : vector<2x256xbf16>, vector<256x64xbf16>, vector<2x64xf32> -> vector<2x64xf32>
    %13 = arith.addf %11, %12 : vector<2x64xf32>
    %c0_5 = arith.constant 0 : index
    %c0_6 = arith.constant 0 : index
    %14 = vector.load %arg3[%c0_5, %c0_6] : memref<2x512xf32, #tpu.memory_space<vmem>>, vector<2x64xf32>
    tpu.vector_store %arg3[%c0_5, %c0_6], %13 {strides = array<i32>} : memref<2x512xf32, #tpu.memory_space<vmem>>, vector<2x64xf32>,
    %c0_7 = arith.constant 0 : index
    %c256 = arith.constant 256 : index
    %15 = vector.load %arg1[%c0_7, %c256] : memref<2x1024xf32, #tpu.memory_space<vmem>>, vector<2x256xf32>
    %16 = arith.truncf %15 : vector<2x256xf32> to vector<2x256xbf16>
    %17 = arith.extf %16 : vector<2x256xbf16> to vector<2x256xf32>
    %18 = arith.subf %15, %17 : vector<2x256xf32>
    %19 = arith.truncf %18 : vector<2x256xf32> to vector<2x256xbf16>
    %20 = arith.extf %19 : vector<2x256xbf16> to vector<2x256xf32>
    %21 = arith.subf %18, %20 : vector<2x256xf32>
    %22 = arith.truncf %21 : vector<2x256xf32> to vector<2x256xbf16>
    %cst_8 = arith.constant dense<0.000000e+00> : vector<2x64xf32>
    %23 = tpu.matmul %16, %0, %cst_8 {dimension_numbers = #tpu.dot_dimension_numbers<[1], [0], [0], [1], [0, 0, 1, 1], [], []>} : vector<2x256xbf16>, vector<256x64xbf16>, vector<2x64xf32> -> vector<2x64xf32>
    %cst_9 = arith.constant dense<0.000000e+00> : vector<2x64xf32>
    %24 = tpu.matmul %19, %0, %cst_9 {dimension_numbers = #tpu.dot_dimension_numbers<[1], [0], [0], [1], [0, 0, 1, 1], [], []>} : vector<2x256xbf16>, vector<256x64xbf16>, vector<2x64xf32> -> vector<2x64xf32>
    %25 = arith.addf %23, %24 : vector<2x64xf32>
    %cst_10 = arith.constant dense<0.000000e+00> : vector<2x64xf32>
    %26 = tpu.matmul %22, %0, %cst_10 {dimension_numbers = #tpu.dot_dimension_numbers<[1], [0], [0], [1], [0, 0, 1, 1], [], []>} : vector<2x256xbf16>, vector<256x64xbf16>, vector<2x64xf32> -> vector<2x64xf32>
    %27 = arith.addf %25, %26 : vector<2x64xf32>
    %c0_11 = arith.constant 0 : index
    %c64 = arith.constant 64 : index
    %28 = vector.load %arg3[%c0_11, %c64] : memref<2x512xf32, #tpu.memory_space<vmem>>, vector<2x64xf32>
    tpu.vector_store %arg3[%c0_11, %c64], %27 {strides = array<i32>} : memref<2x512xf32, #tpu.memory_space<vmem>>, vector<2x64xf32>,
    %c0_12 = arith.constant 0 : index
    %c512 = arith.constant 512 : index
    %29 = vector.load %arg1[%c0_12, %c512] : memref<2x1024xf32, #tpu.memory_space<vmem>>, vector<2x256xf32>
    %30 = arith.truncf %29 : vector<2x256xf32> to vector<2x256xbf16>
    %31 = arith.extf %30 : vector<2x256xbf16> to vector<2x256xf32>
    %32 = arith.subf %29, %31 : vector<2x256xf32>
    %33 = arith.truncf %32 : vector<2x256xf32> to vector<2x256xbf16>
    %34 = arith.extf %33 : vector<2x256xbf16> to vector<2x256xf32>
    %35 = arith.subf %32, %34 : vector<2x256xf32>
    %36 = arith.truncf %35 : vector<2x256xf32> to vector<2x256xbf16>
    %cst_13 = arith.constant dense<0.000000e+00> : vector<2x64xf32>
    %37 = tpu.matmul %30, %0, %cst_13 {dimension_numbers = #tpu.dot_dimension_numbers<[1], [0], [0], [1], [0, 0, 1, 1], [], []>} : vector<2x256xbf16>, vector<256x64xbf16>, vector<2x64xf32> -> vector<2x64xf32>
    %cst_14 = arith.constant dense<0.000000e+00> : vector<2x64xf32>
    %38 = tpu.matmul %33, %0, %cst_14 {dimension_numbers = #tpu.dot_dimension_numbers<[1], [0], [0], [1], [0, 0, 1, 1], [], []>} : vector<2x256xbf16>, vector<256x64xbf16>, vector<2x64xf32> -> vector<2x64xf32>
    %39 = arith.addf %37, %38 : vector<2x64xf32>
    %cst_15 = arith.constant dense<0.000000e+00> : vector<2x64xf32>
    %40 = tpu.matmul %36, %0, %cst_15 {dimension_numbers = #tpu.dot_dimension_numbers<[1], [0], [0], [1], [0, 0, 1, 1], [], []>} : vector<2x256xbf16>, vector<256x64xbf16>, vector<2x64xf32> -> vector<2x64xf32>
    %41 = arith.addf %39, %40 : vector<2x64xf32>
    %c0_16 = arith.constant 0 : index
    %c128 = arith.constant 128 : index
    %42 = vector.load %arg3[%c0_16, %c128] : memref<2x512xf32, #tpu.memory_space<vmem>>, vector<2x64xf32>
    tpu.vector_store %arg3[%c0_16, %c128], %41 {strides = array<i32>} : memref<2x512xf32, #tpu.memory_space<vmem>>, vector<2x64xf32>,
    %c0_17 = arith.constant 0 : index
    %c768 = arith.constant 768 : index
    %43 = vector.load %arg1[%c0_17, %c768] : memref<2x1024xf32, #tpu.memory_space<vmem>>, vector<2x256xf32>
    %44 = arith.truncf %43 : vector<2x256xf32> to vector<2x256xbf16>
    %45 = arith.extf %44 : vector<2x256xbf16> to vector<2x256xf32>
    %46 = arith.subf %43, %45 : vector<2x256xf32>
    %47 = arith.truncf %46 : vector<2x256xf32> to vector<2x256xbf16>
    %48 = arith.extf %47 : vector<2x256xbf16> to vector<2x256xf32>
    %49 = arith.subf %46, %48 : vector<2x256xf32>
    %50 = arith.truncf %49 : vector<2x256xf32> to vector<2x256xbf16>
    %cst_18 = arith.constant dense<0.000000e+00> : vector<2x64xf32>
    %51 = tpu.matmul %44, %0, %cst_18 {dimension_numbers = #tpu.dot_dimension_numbers<[1], [0], [0], [1], [0, 0, 1, 1], [], []>} : vector<2x256xbf16>, vector<256x64xbf16>, vector<2x64xf32> -> vector<2x64xf32>
    %cst_19 = arith.constant dense<0.000000e+00> : vector<2x64xf32>
    %52 = tpu.matmul %47, %0, %cst_19 {dimension_numbers = #tpu.dot_dimension_numbers<[1], [0], [0], [1], [0, 0, 1, 1], [], []>} : vector<2x256xbf16>, vector<256x64xbf16>, vector<2x64xf32> -> vector<2x64xf32>
    %53 = arith.addf %51, %52 : vector<2x64xf32>
    %cst_20 = arith.constant dense<0.000000e+00> : vector<2x64xf32>
    %54 = tpu.matmul %50, %0, %cst_20 {dimension_numbers = #tpu.dot_dimension_numbers<[1], [0], [0], [1], [0, 0, 1, 1], [], []>} : vector<2x256xbf16>, vector<256x64xbf16>, vector<2x64xf32> -> vector<2x64xf32>
    %55 = arith.addf %53, %54 : vector<2x64xf32>
    %c0_21 = arith.constant 0 : index
    %c192 = arith.constant 192 : index
    %56 = vector.load %arg3[%c0_21, %c192] : memref<2x512xf32, #tpu.memory_space<vmem>>, vector<2x64xf32>
    tpu.vector_store %arg3[%c0_21, %c192], %55 {strides = array<i32>} : memref<2x512xf32, #tpu.memory_space<vmem>>, vector<2x64xf32>,
    %cst_22 = arith.constant 0.000000e+00 : f32
    %57 = vector.broadcast %cst_22 : f32 to vector<2x256xf32>
    %c0_23 = arith.constant 0 : index
    %c256_24 = arith.constant 256 : index
    %58 = vector.load %arg3[%c0_23, %c256_24] : memref<2x512xf32, #tpu.memory_space<vmem>>, vector<2x256xf32>
    tpu.vector_store %arg3[%c0_23, %c256_24], %57 {strides = array<i32>} : memref<2x512xf32, #tpu.memory_space<vmem>>, vector<2x256xf32>,
    return
  }
  func.func @transform_0(%arg0: i32) -> (i32, i32) {
    %c0_i32 = arith.constant 0 : i32
    %c0_i32_0 = arith.constant 0 : i32
    return %arg0, %c0_i32 : i32, i32
  }
  func.func @transform_1(%arg0: i32) -> (i32, i32) {
    %c0_i32 = arith.constant 0 : i32
    %c0_i32_0 = arith.constant 0 : i32
    %c0_i32_1 = arith.constant 0 : i32
    return %c0_i32, %c0_i32_0 : i32, i32
  }
  func.func @transform_2(%arg0: i32) -> (i32, i32) {
    %c0_i32 = arith.constant 0 : i32
    %c0_i32_0 = arith.constant 0 : i32
    return %arg0, %c0_i32 : i32, i32
  }
}

</mosaic_0001>

<bundles_post_ra>
// kernel: tpu_custom_call.1
= control target key start
LH: loop header
LB: loop body
LE: loop exit
PB: predicated region body
PF: predicated region fallthrough
CT: control target
= control target key end

     0   :  { %s1138_s0 = inlined_call_operand.vmem [shape: f32[2,1024], index: 0, kind: input, shape index: {}]   ;;  %s1139_s1 = inlined_call_operand.vmem [shape: bf16[256,64], index: 1, kind: input, shape index: {}]   ;;  %s1140_s2 = inlined_call_operand.hbm [shape: f32[2,512], index: 2, kind: output, shape index: {}]  }
   0x1   :  { %v830_v0 = vld [vmem:[%s1139_s1 + $0x38] sm:$0xff]  ;;  %v842_v2 = vld [vmem:[%s1139_s1 + $0x30] sm:$0xff]  ;;  %v44_v4 = vld [vmem:[%s1138_s0] sm:$0xf] }
   0x2   :  { %v835_v1 = vld [vmem:[%s1139_s1 + $0x78] sm:$0xff]  ;;  %187 = vmatpush.bf16.msra.mxu0 %v830_v0  ;;  %v847_v3 = vld [vmem:[%s1139_s1 + $0x70] sm:$0xff]  ;;  %220 = vmatpush.bf16.msra.mxu2 %v830_v0 }
   0x3   :  { %200 = vmatpush.bf16.msra.mxu1 %v835_v1  ;;  %233 = vmatpush.bf16.msra.mxu3 %v835_v1 }
   0x4   :  { %7 = vsyncpa [#allocation3], 0  ;;  %v859_v5 = vld [vmem:[%s1139_s1 + $0x28] sm:$0xff]  ;;  %46 = vst [vmem:[#allocation1] ss:$4 sm:$0xff] %v44_v4  ;;  %v873_v7 = vld [vmem:[%s1139_s1 + $0x20] sm:$0xff] }
   0x5   :  { %v864_v6 = vld [vmem:[%s1139_s1 + $0x68] sm:$0xff]  ;;  %v878_v8 = vld [vmem:[%s1139_s1 + $0x60] sm:$0xff]  ;;  %v887_v11 = vld [vmem:[%s1139_s1 + $0x18] sm:$0xff]  ;;  %vm57_vm0 = vcmask 1041408   ;;  %vm273_vm1 = vcmask 517120   ;;  %vm411_vm2 = vcmask 1041920  }
   0x6   :  { %188 = vmatpush.bf16.msra.mxu0 %v842_v2  ;;  %221 = vmatpush.bf16.msra.mxu2 %v842_v2  ;;  %v892_v12 = vld [vmem:[%s1139_s1 + $0x58] sm:$0xff]  ;;  %v901_v16 = vld [vmem:[%s1139_s1 + $0x10] sm:$0xff]  ;;  %v916_v21 = vld [vmem:[%s1139_s1 + $0x8] sm:$0xff]  ;;  %s811_s20 = smov [#allocation2]   ;;  %s691_s24 = sshll.u32 %s1140_s2, 4  ;;  %s692_s24 = int_to_ptr.hbm [resolvable:$true] %s691_s24 }
   0x7   :  { %201 = vmatpush.bf16.msra.mxu1 %v847_v3  ;;  %234 = vmatpush.bf16.msra.mxu3 %v847_v3  ;;  %v906_v17 = vld [vmem:[%s1139_s1 + $0x50] sm:$0xff]  ;;  %v921_v22 = vld [vmem:[%s1139_s1 + $0x48] sm:$0xff]  ;;  %v930_v23 = vld [vmem:[%s1139_s1] sm:$0xff]  ;;  %s689_s21 = sshll.u32 %s811_s20, 4  ;;  %s690_s21 = int_to_ptr.vmem [resolvable:$true] %s689_s21 }
   0x8   :  { %v935_v24 = vld [vmem:[%s1139_s1 + $0x40] sm:$0xff] }
   0x9   :  { %v275_v41 = vld [vmem:[%s1138_s0 + $0x4] sm:$0xf] }
   0xa   :  { %189 = vmatpush.bf16.msra.mxu0 %v859_v5  ;;  %222 = vmatpush.bf16.msra.mxu2 %v859_v5 }
   0xb   :  { %202 = vmatpush.bf16.msra.mxu1 %v864_v6  ;;  %235 = vmatpush.bf16.msra.mxu3 %v864_v6  ;;  %v47_v9 = vld.sshfl [vmem:[#allocation1] sm:$0xff pattern:$0x73625140]  ;;  %v48_v10 = vld.sshfl [vmem:[#allocation1 + $0x8] sm:$0xff pattern:$0x73625140] }
   0xc   :  { %v51_v13 = vpack.c.bf16 %v48_v10, %v47_v9 }
   0xe   :  { %190 = vmatpush.bf16.msra.mxu0 %v873_v7  ;;  %223 = vmatpush.bf16.msra.mxu2 %v873_v7  ;;  %v52_v14 = vunpack.c.l.bf16 %v51_v13  ;;  %v53_v15 = vunpack.c.h.bf16 %v51_v13  ;;  %v214_v25 = vunpack.c.l.b16 %v51_v13  ;;  %v215_v26 = vunpack.c.h.b16 %v51_v13 }
   0xf   :  { %203 = vmatpush.bf16.msra.mxu1 %v878_v8  ;;  %236 = vmatpush.bf16.msra.mxu3 %v878_v8 }
  0x10   :  { %v56_v18 = vrot.slane %v53_v15, 6  ;;  %v216_v29 = vpack.c.b16 %v214_v25, %v214_v25  ;;  %v217_v30 = vpack.c.b16 %v215_v26, %v215_v26 }
  0x12   :  { %191 = vmatpush.bf16.msra.mxu0 %v887_v11  ;;  %224 = vmatpush.bf16.msra.mxu2 %v887_v11  ;;  %v58_v19 = vsel %vm57_vm0, %v52_v14, %v56_v18  ;;  %v413_v14 = vld [vmem:[%s1138_s0 + $0x8] sm:$0xf] }
  0x13   :  { %204 = vmatpush.bf16.msra.mxu1 %v892_v12  ;;  %237 = vmatpush.bf16.msra.mxu3 %v892_v12  ;;  %v60_v20 = vsub.f32 %v44_v4, %v58_v19 }
  0x15   :  { %62 = vst [vmem:[#allocation1] ss:$4 sm:$0xff] %v60_v20 }
  0x16   :  { %192 = vmatpush.bf16.msra.mxu0 %v901_v16  ;;  %225 = vmatpush.bf16.msra.mxu2 %v901_v16 }
  0x17   :  { %205 = vmatpush.bf16.msra.mxu1 %v906_v17  ;;  %238 = vmatpush.bf16.msra.mxu3 %v906_v17 }
  0x1a   :  { %193 = vmatpush.bf16.msra.mxu0 %v916_v21  ;;  %226 = vmatpush.bf16.msra.mxu2 %v916_v21 }
  0x1b   :  { %206 = vmatpush.bf16.msra.mxu1 %v921_v22  ;;  %239 = vmatpush.bf16.msra.mxu3 %v921_v22 }
  0x1c   :  { %v63_v27 = vld.sshfl [vmem:[#allocation1] sm:$0xff pattern:$0x73625140]  ;;  %v64_v28 = vld.sshfl [vmem:[#allocation1 + $0x8] sm:$0xff pattern:$0x73625140] }
  0x1d   :  { %v67_v31 = vpack.c.bf16 %v64_v28, %v63_v27 }
  0x1e   :  { %194 = vmatpush.bf16.msra.mxu0 %v930_v23  ;;  %227 = vmatpush.bf16.msra.mxu2 %v930_v23 }
  0x1f   :  { %207 = vmatpush.bf16.msra.mxu1 %v935_v24  ;;  %240 = vmatpush.bf16.msra.mxu3 %v935_v24  ;;  %v68_v32 = vunpack.c.l.bf16 %v67_v31  ;;  %v69_v33 = vunpack.c.h.bf16 %v67_v31  ;;  %v85_v34 = vunpack.c.l.b16 %v67_v31  ;;  %v86_v35 = vunpack.c.h.b16 %v67_v31 }
  0x21   :  { %228 = vmatmul.bf16.vlgmr.msra.gmra.mxu2 %v216_v29  ;;  %v72_v36 = vrot.slane %v69_v33, 6  ;;  %v87_v37 = vpack.c.b16 %v85_v34, %v85_v34  ;;  %v88_v38 = vpack.c.b16 %v86_v35, %v86_v35 }
  0x22   :  { %246 = vmatpush.bf16.msrb.mxu0 %v830_v0  ;;  %321 = vmatpush.bf16.msrb.mxu2 %v830_v0 }
  0x23   :  { %259 = vmatpush.bf16.msrb.mxu1 %v835_v1  ;;  %334 = vmatpush.bf16.msrb.mxu3 %v835_v1  ;;  %v73_v39 = vsel %vm57_vm0, %v68_v32, %v72_v36 }
  0x24   :  { %241 = vmatmul.bf16.vlgmr.msra.gmra.mxu3 %v217_v30  ;;  %v75_v40 = vsub.f32 %v60_v20, %v73_v39  ;;  %195 = vmatmul.bf16.vlgmr.msra.gmra.mxu0 %v87_v37 }
  0x25   :  { %208 = vmatmul.bf16.vlgmr.msra.gmra.mxu1 %v88_v38 }
  0x26   :  { %247 = vmatpush.bf16.msrb.mxu0 %v842_v2  ;;  %322 = vmatpush.bf16.msrb.mxu2 %v842_v2  ;;  %77 = vst [vmem:[#allocation1] ss:$4 sm:$0xff] %v75_v40 }
  0x27   :  { %260 = vmatpush.bf16.msrb.mxu1 %v847_v3  ;;  %335 = vmatpush.bf16.msrb.mxu3 %v847_v3 }
  0x2a   :  { %248 = vmatpush.bf16.msrb.mxu0 %v859_v5  ;;  %323 = vmatpush.bf16.msrb.mxu2 %v859_v5 }
  0x2b   :  { %261 = vmatpush.bf16.msrb.mxu1 %v864_v6  ;;  %336 = vmatpush.bf16.msrb.mxu3 %v864_v6 }
  0x2d   :  { %v78_v42 = vld.sshfl [vmem:[#allocation1] sm:$0xff pattern:$0x73625140]  ;;  %v79_v43 = vld.sshfl [vmem:[#allocation1 + $0x8] sm:$0xff pattern:$0x73625140] }
  0x2e   :  { %249 = vmatpush.bf16.msrb.mxu0 %v873_v7  ;;  %324 = vmatpush.bf16.msrb.mxu2 %v873_v7  ;;  %277 = vst [vmem:[#allocation1] ss:$4 sm:$0xff] %v275_v41  ;;  %v82_v49 = vpack.c.bf16 %v78_v42, %v78_v42  ;;  %v83_v50 = vpack.c.bf16 %v79_v43, %v79_v43 }
  0x2f   :  { %262 = vmatpush.bf16.msrb.mxu1 %v878_v8  ;;  %337 = vmatpush.bf16.msrb.mxu3 %v878_v8 }
  0x32   :  { %250 = vmatpush.bf16.msrb.mxu0 %v887_v11  ;;  %325 = vmatpush.bf16.msrb.mxu2 %v887_v11 }
  0x33   :  { %263 = vmatpush.bf16.msrb.mxu1 %v892_v12  ;;  %338 = vmatpush.bf16.msrb.mxu3 %v892_v12 }
  0x35   :  { %v278_v44 = vld.sshfl [vmem:[#allocation1] sm:$0xff pattern:$0x73625140]  ;;  %v279_v45 = vld.sshfl [vmem:[#allocation1 + $0x8] sm:$0xff pattern:$0x73625140] }
  0x36   :  { %251 = vmatpush.bf16.msrb.mxu0 %v901_v16  ;;  %326 = vmatpush.bf16.msrb.mxu2 %v901_v16  ;;  %v973_v46 = vpack.c.bf16 %v279_v45, %v278_v44 }
  0x37   :  { %264 = vmatpush.bf16.msrb.mxu1 %v906_v17  ;;  %339 = vmatpush.bf16.msrb.mxu3 %v906_v17 }
  0x38   :  { %v283_v47 = vunpack.c.l.bf16 %v973_v46  ;;  %v284_v48 = vunpack.c.h.bf16 %v973_v46  ;;  %v348_v10 = vunpack.c.l.b16 %v973_v46  ;;  %v349_v13 = vunpack.c.h.b16 %v973_v46 }
  0x3a   :  { %252 = vmatpush.bf16.msrb.mxu0 %v916_v21  ;;  %327 = vmatpush.bf16.msrb.mxu2 %v916_v21  ;;  %v287_v51 = vrot.slane %v284_v48, 6  ;;  %v350_v19 = vpack.c.b16 %v348_v10, %v348_v10  ;;  %v351_v20 = vpack.c.b16 %v349_v13, %v349_v13 }
  0x3b   :  { %265 = vmatpush.bf16.msrb.mxu1 %v921_v22  ;;  %340 = vmatpush.bf16.msrb.mxu3 %v921_v22 }
  0x3c   :  { %v288_v52 = vsel %vm57_vm0, %v283_v47, %v287_v51  ;;  %v546_v51 = vld [vmem:[%s1138_s0 + $0xc] sm:$0xf]  ;;  %s809_s0 = smov 64  }
  0x3d   :  { %v290_v53 = vsub.f32 %v275_v41, %v288_v52 }
  0x3e   :  { %253 = vmatpush.bf16.msrb.mxu0 %v930_v23  ;;  %328 = vmatpush.bf16.msrb.mxu2 %v930_v23 }
  0x3f   :  { %266 = vmatpush.bf16.msrb.mxu1 %v935_v24  ;;  %341 = vmatpush.bf16.msrb.mxu3 %v935_v24  ;;  %292 = vst [vmem:[#allocation1] ss:$4 sm:$0xff] %v290_v53 }
  0x41   :  { %254 = vmatmul.bf16.vlgmr.msrb.gmra.mxu0 %v82_v49 }
  0x42   :  { %354 = vmatpush.bf16.msra.mxu0 %v830_v0  ;;  %380 = vmatpush.bf16.msra.mxu2 %v830_v0 }
  0x43   :  { %367 = vmatpush.bf16.msra.mxu1 %v835_v1  ;;  %393 = vmatpush.bf16.msra.mxu3 %v835_v1 }
  0x44   :  { %267 = vmatmul.bf16.vlgmr.msrb.gmra.mxu1 %v83_v50 }
  0x46   :  { %355 = vmatpush.bf16.msra.mxu0 %v842_v2  ;;  %381 = vmatpush.bf16.msra.mxu2 %v842_v2  ;;  %v293_v54 = vld.sshfl [vmem:[#allocation1] sm:$0xff pattern:$0x73625140]  ;;  %v294_v55 = vld.sshfl [vmem:[#allocation1 + $0x8] sm:$0xff pattern:$0x73625140] }
  0x47   :  { %368 = vmatpush.bf16.msra.mxu1 %v847_v3  ;;  %394 = vmatpush.bf16.msra.mxu3 %v847_v3  ;;  %v297_v56 = vpack.c.bf16 %v294_v55, %v293_v54 }
  0x49   :  { %v298_v57 = vunpack.c.l.bf16 %v297_v56  ;;  %v299_v58 = vunpack.c.h.bf16 %v297_v56  ;;  %v315_v59 = vunpack.c.l.b16 %v297_v56  ;;  %v316_v60 = vunpack.c.h.b16 %v297_v56 }
  0x4a   :  { %356 = vmatpush.bf16.msra.mxu0 %v859_v5  ;;  %382 = vmatpush.bf16.msra.mxu2 %v859_v5 }
  0x4b   :  { %369 = vmatpush.bf16.msra.mxu1 %v864_v6  ;;  %395 = vmatpush.bf16.msra.mxu3 %v864_v6  ;;  %v302_v61 = vrot.slane %v299_v58, 6  ;;  %v317_v62 = vpack.c.b16 %v315_v59, %v315_v59  ;;  %v318_v63 = vpack.c.b16 %v316_v60, %v316_v60 }
  0x4d   :  { %v303_v4 = vsel %vm57_vm0, %v298_v57, %v302_v61  ;;  %329 = vmatmul.bf16.vlgmr.msrb.gmra.mxu2 %v317_v62  ;;  %342 = vmatmul.bf16.vlgmr.msrb.gmra.mxu3 %v318_v63 }
  0x4e   :  { %357 = vmatpush.bf16.msra.mxu0 %v873_v7  ;;  %383 = vmatpush.bf16.msra.mxu2 %v873_v7  ;;  %v305_v9 = vsub.f32 %v290_v53, %v303_v4 }
  0x4f   :  { %370 = vmatpush.bf16.msra.mxu1 %v878_v8  ;;  %396 = vmatpush.bf16.msra.mxu3 %v878_v8 }
  0x50   :  { %307 = vst [vmem:[#allocation1] ss:$4 sm:$0xff] %v305_v9 }
  0x52   :  { %358 = vmatpush.bf16.msra.mxu0 %v887_v11  ;;  %384 = vmatpush.bf16.msra.mxu2 %v887_v11 }
  0x53   :  { %371 = vmatpush.bf16.msra.mxu1 %v892_v12  ;;  %397 = vmatpush.bf16.msra.mxu3 %v892_v12 }
  0x56   :  { %359 = vmatpush.bf16.msra.mxu0 %v901_v16  ;;  %385 = vmatpush.bf16.msra.mxu2 %v901_v16 }
  0x57   :  { %372 = vmatpush.bf16.msra.mxu1 %v906_v17  ;;  %398 = vmatpush.bf16.msra.mxu3 %v906_v17  ;;  %v308_v15 = vld.sshfl [vmem:[#allocation1] sm:$0xff pattern:$0x73625140]  ;;  %v309_v18 = vld.sshfl [vmem:[#allocation1 + $0x8] sm:$0xff pattern:$0x73625140] }
  0x58   :  { %415 = vst [vmem:[#allocation1] ss:$4 sm:$0xff] %v413_v14  ;;  %v312_v25 = vpack.c.bf16 %v308_v15, %v308_v15  ;;  %v313_v26 = vpack.c.bf16 %v309_v18, %v309_v18 }
  0x5a   :  { %360 = vmatpush.bf16.msra.mxu0 %v916_v21  ;;  %386 = vmatpush.bf16.msra.mxu2 %v916_v21 }
  0x5b   :  { %373 = vmatpush.bf16.msra.mxu1 %v921_v22  ;;  %399 = vmatpush.bf16.msra.mxu3 %v921_v22 }
  0x5e   :  { %361 = vmatpush.bf16.msra.mxu0 %v930_v23  ;;  %387 = vmatpush.bf16.msra.mxu2 %v930_v23 }
  0x5f   :  { %374 = vmatpush.bf16.msra.mxu1 %v935_v24  ;;  %400 = vmatpush.bf16.msra.mxu3 %v935_v24  ;;  %v416_v27 = vld.sshfl [vmem:[#allocation1] sm:$0xff pattern:$0x73625140]  ;;  %v417_v28 = vld.sshfl [vmem:[#allocation1 + $0x8] sm:$0xff pattern:$0x73625140] }
  0x60   :  { %v420_v29 = vpack.c.bf16 %v417_v28, %v416_v27 }
  0x61   :  { %362 = vmatmul.bf16.vlgmr.msra.gmra.mxu0 %v350_v19  ;;  %388 = vmatmul.bf16.vlgmr.msra.gmra.mxu2 %v312_v25 }
  0x62   :  { %459 = vmatpush.bf16.msrb.mxu0 %v830_v0  ;;  %492 = vmatpush.bf16.msrb.mxu2 %v830_v0  ;;  %v421_v30 = vunpack.c.l.bf16 %v420_v29  ;;  %v422_v31 = vunpack.c.h.bf16 %v420_v29  ;;  %v486_v42 = vunpack.c.l.b16 %v420_v29  ;;  %v487_v43 = vunpack.c.h.b16 %v420_v29 }
  0x63   :  { %472 = vmatpush.bf16.msrb.mxu1 %v835_v1  ;;  %505 = vmatpush.bf16.msrb.mxu3 %v835_v1 }
  0x64   :  { %375 = vmatmul.bf16.vlgmr.msra.gmra.mxu1 %v351_v20  ;;  %401 = vmatmul.bf16.vlgmr.msra.gmra.mxu3 %v313_v26  ;;  %v425_v32 = vrot.slane %v422_v31, 6  ;;  %v488_v49 = vpack.c.b16 %v486_v42, %v486_v42  ;;  %v489_v50 = vpack.c.b16 %v487_v43, %v487_v43 }
  0x66   :  { %460 = vmatpush.bf16.msrb.mxu0 %v842_v2  ;;  %493 = vmatpush.bf16.msrb.mxu2 %v842_v2  ;;  %v426_v33 = vsel %vm57_vm0, %v421_v30, %v425_v32 }
  0x67   :  { %473 = vmatpush.bf16.msrb.mxu1 %v847_v3  ;;  %506 = vmatpush.bf16.msrb.mxu3 %v847_v3  ;;  %v428_v34 = vsub.f32 %v413_v14, %v426_v33 }
  0x69   :  { %430 = vst [vmem:[#allocation1] ss:$4 sm:$0xff] %v428_v34 }
  0x6a   :  { %461 = vmatpush.bf16.msrb.mxu0 %v859_v5  ;;  %494 = vmatpush.bf16.msrb.mxu2 %v859_v5 }
  0x6b   :  { %474 = vmatpush.bf16.msrb.mxu1 %v864_v6  ;;  %507 = vmatpush.bf16.msrb.mxu3 %v864_v6 }
  0x6e   :  { %462 = vmatpush.bf16.msrb.mxu0 %v873_v7  ;;  %495 = vmatpush.bf16.msrb.mxu2 %v873_v7 }
  0x6f   :  { %475 = vmatpush.bf16.msrb.mxu1 %v878_v8  ;;  %508 = vmatpush.bf16.msrb.mxu3 %v878_v8 }
  0x70   :  { %v431_v35 = vld.sshfl [vmem:[#allocation1] sm:$0xff pattern:$0x73625140]  ;;  %v432_v36 = vld.sshfl [vmem:[#allocation1 + $0x8] sm:$0xff pattern:$0x73625140] }
  0x71   :  { %v435_v37 = vpack.c.bf16 %v432_v36, %v431_v35 }
  0x72   :  { %463 = vmatpush.bf16.msrb.mxu0 %v887_v11  ;;  %496 = vmatpush.bf16.msrb.mxu2 %v887_v11 }
  0x73   :  { %476 = vmatpush.bf16.msrb.mxu1 %v892_v12  ;;  %509 = vmatpush.bf16.msrb.mxu3 %v892_v12  ;;  %v436_v38 = vunpack.c.l.bf16 %v435_v37  ;;  %v437_v39 = vunpack.c.h.bf16 %v435_v37  ;;  %v453_v40 = vunpack.c.l.b16 %v435_v37  ;;  %v454_v41 = vunpack.c.h.b16 %v435_v37 }
  0x75   :  { %v440_v44 = vrot.slane %v437_v39, 6  ;;  %v455_v46 = vpack.c.b16 %v453_v40, %v453_v40  ;;  %v456_v47 = vpack.c.b16 %v454_v41, %v454_v41 }
  0x76   :  { %464 = vmatpush.bf16.msrb.mxu0 %v901_v16  ;;  %497 = vmatpush.bf16.msrb.mxu2 %v901_v16 }
  0x77   :  { %477 = vmatpush.bf16.msrb.mxu1 %v906_v17  ;;  %510 = vmatpush.bf16.msrb.mxu3 %v906_v17  ;;  %v441_v45 = vsel %vm57_vm0, %v436_v38, %v440_v44 }
  0x78   :  { %v443_v48 = vsub.f32 %v428_v34, %v441_v45 }
  0x7a   :  { %465 = vmatpush.bf16.msrb.mxu0 %v916_v21  ;;  %498 = vmatpush.bf16.msrb.mxu2 %v916_v21  ;;  %445 = vst [vmem:[#allocation1] ss:$4 sm:$0xff] %v443_v48 }
  0x7b   :  { %478 = vmatpush.bf16.msrb.mxu1 %v921_v22  ;;  %511 = vmatpush.bf16.msrb.mxu3 %v921_v22 }
  0x7e   :  { %466 = vmatpush.bf16.msrb.mxu0 %v930_v23  ;;  %499 = vmatpush.bf16.msrb.mxu2 %v930_v23 }
  0x7f   :  { %479 = vmatpush.bf16.msrb.mxu1 %v935_v24  ;;  %512 = vmatpush.bf16.msrb.mxu3 %v935_v24 }
  0x81   :  { %467 = vmatmul.bf16.vlgmr.msrb.gmra.mxu0 %v455_v46  ;;  %500 = vmatmul.bf16.vlgmr.msrb.gmra.mxu2 %v488_v49  ;;  %v446_v52 = vld.sshfl [vmem:[#allocation1] sm:$0xff pattern:$0x73625140]  ;;  %v447_v53 = vld.sshfl [vmem:[#allocation1 + $0x8] sm:$0xff pattern:$0x73625140] }
  0x82   :  { %518 = vmatpush.bf16.msra.mxu0 %v830_v0  ;;  %592 = vmatpush.bf16.msra.mxu2 %v830_v0  ;;  %548 = vst [vmem:[#allocation1] ss:$4 sm:$0xff] %v546_v51  ;;  %v450_v62 = vpack.c.bf16 %v446_v52, %v446_v52  ;;  %v451_v63 = vpack.c.bf16 %v447_v53, %v447_v53 }
  0x83   :  { %531 = vmatpush.bf16.msra.mxu1 %v835_v1  ;;  %605 = vmatpush.bf16.msra.mxu3 %v835_v1 }
  0x84   :  { %480 = vmatmul.bf16.vlgmr.msrb.gmra.mxu1 %v456_v47  ;;  %513 = vmatmul.bf16.vlgmr.msrb.gmra.mxu3 %v489_v50 }
  0x86   :  { %519 = vmatpush.bf16.msra.mxu0 %v842_v2  ;;  %593 = vmatpush.bf16.msra.mxu2 %v842_v2 }
  0x87   :  { %532 = vmatpush.bf16.msra.mxu1 %v847_v3  ;;  %606 = vmatpush.bf16.msra.mxu3 %v847_v3 }
  0x89   :  { %v549_v54 = vld.sshfl [vmem:[#allocation1] sm:$0xff pattern:$0x73625140]  ;;  %v550_v55 = vld.sshfl [vmem:[#allocation1 + $0x8] sm:$0xff pattern:$0x73625140] }
  0x8a   :  { %520 = vmatpush.bf16.msra.mxu0 %v859_v5  ;;  %594 = vmatpush.bf16.msra.mxu2 %v859_v5  ;;  %v1079_v56 = vpack.c.bf16 %v550_v55, %v549_v54 }
  0x8b   :  { %533 = vmatpush.bf16.msra.mxu1 %v864_v6  ;;  %607 = vmatpush.bf16.msra.mxu3 %v864_v6 }
  0x8c   :  { %v554_v57 = vunpack.c.l.bf16 %v1079_v56  ;;  %v555_v58 = vunpack.c.h.bf16 %v1079_v56 }
  0x8e   :  { %521 = vmatpush.bf16.msra.mxu0 %v873_v7  ;;  %595 = vmatpush.bf16.msra.mxu2 %v873_v7  ;;  %v558_v59 = vrot.slane %v555_v58, 6 }
  0x8f   :  { %534 = vmatpush.bf16.msra.mxu1 %v878_v8  ;;  %608 = vmatpush.bf16.msra.mxu3 %v878_v8 }
  0x90   :  { %v559_v60 = vsel %vm57_vm0, %v554_v57, %v558_v59 }
  0x91   :  { %v561_v61 = vsub.f32 %v546_v51, %v559_v60 }
  0x92   :  { %522 = vmatpush.bf16.msra.mxu0 %v887_v11  ;;  %596 = vmatpush.bf16.msra.mxu2 %v887_v11 }
  0x93   :  { %535 = vmatpush.bf16.msra.mxu1 %v892_v12  ;;  %609 = vmatpush.bf16.msra.mxu3 %v892_v12  ;;  %563 = vst [vmem:[#allocation1] ss:$4 sm:$0xff] %v561_v61 }
  0x96   :  { %523 = vmatpush.bf16.msra.mxu0 %v901_v16  ;;  %597 = vmatpush.bf16.msra.mxu2 %v901_v16 }
  0x97   :  { %536 = vmatpush.bf16.msra.mxu1 %v906_v17  ;;  %610 = vmatpush.bf16.msra.mxu3 %v906_v17 }
  0x9a   :  { %524 = vmatpush.bf16.msra.mxu0 %v916_v21  ;;  %598 = vmatpush.bf16.msra.mxu2 %v916_v21  ;;  %v564_v4 = vld.sshfl [vmem:[#allocation1] sm:$0xff pattern:$0x73625140]  ;;  %v565_v9 = vld.sshfl [vmem:[#allocation1 + $0x8] sm:$0xff pattern:$0x73625140] }
  0x9b   :  { %537 = vmatpush.bf16.msra.mxu1 %v921_v22  ;;  %611 = vmatpush.bf16.msra.mxu3 %v921_v22  ;;  %v568_v10 = vpack.c.bf16 %v565_v9, %v564_v4 }
  0x9d   :  { %v569_v13 = vunpack.c.l.bf16 %v568_v10  ;;  %v570_v14 = vunpack.c.h.bf16 %v568_v10  ;;  %v586_v15 = vunpack.c.l.b16 %v568_v10  ;;  %v587_v18 = vunpack.c.h.b16 %v568_v10 }
  0x9e   :  { %525 = vmatpush.bf16.msra.mxu0 %v930_v23  ;;  %599 = vmatpush.bf16.msra.mxu2 %v930_v23 }
  0x9f   :  { %538 = vmatpush.bf16.msra.mxu1 %v935_v24  ;;  %612 = vmatpush.bf16.msra.mxu3 %v935_v24  ;;  %v589_v19 = vpack.c.b16 %v587_v18, %v587_v18 }
  0xa1   :  { %526 = vmatmul.bf16.vlgmr.msra.gmra.mxu0 %v450_v62 }
  0xa2   :  { %625 = vmatpush.bf16.msrb.mxu0 %v830_v0  ;;  %651 = vmatpush.bf16.msrb.mxu2 %v830_v0  ;;  %v573_v0 = vrot.slane %v570_v14, 6 }
  0xa3   :  { %638 = vmatpush.bf16.msrb.mxu1 %v835_v1  ;;  %664 = vmatpush.bf16.msrb.mxu3 %v835_v1  ;;  %v588_v1 = vpack.c.b16 %v586_v15, %v586_v15 }
  0xa4   :  { %539 = vmatmul.bf16.vlgmr.msra.gmra.mxu1 %v451_v63  ;;  %v574_v20 = vsel %vm57_vm0, %v569_v13, %v573_v0  ;;  %613 = vmatmul.bf16.vlgmr.msra.gmra.mxu3 %v589_v19  ;;  %v229_v26 = vpop.f32.mrf.mxu2 }
  0xa5   :  { %600 = vmatmul.bf16.vlgmr.msra.gmra.mxu2 %v588_v1  ;;  %v576_v25 = vsub.f32 %v561_v61, %v574_v20 }
  0xa6   :  { %626 = vmatpush.bf16.msrb.mxu0 %v842_v2  ;;  %652 = vmatpush.bf16.msrb.mxu2 %v842_v2  ;;  %v196_v2 = vpop.f32.mrf.mxu0 }
  0xa7   :  { %639 = vmatpush.bf16.msrb.mxu1 %v847_v3  ;;  %665 = vmatpush.bf16.msrb.mxu3 %v847_v3  ;;  %v209_v3 = vpop.f32.mrf.mxu1  ;;  %v242_v27 = vpop.f32.mrf.mxu3  ;;  %578 = vst [vmem:[#allocation1] ss:$4 sm:$0xff] %v576_v25 }
  0xa8   :  { %v210_v30 = vadd.f32 %v209_v3, %v196_v2 }
  0xaa   :  { %627 = vmatpush.bf16.msrb.mxu0 %v859_v5  ;;  %653 = vmatpush.bf16.msrb.mxu2 %v859_v5 }
  0xab   :  { %640 = vmatpush.bf16.msrb.mxu1 %v864_v6  ;;  %666 = vmatpush.bf16.msrb.mxu3 %v864_v6 }
  0xac   :  { %v231_v28 = vpop.f32.mrf.mxu2 }
  0xae   :  { %628 = vmatpush.bf16.msrb.mxu0 %v873_v7  ;;  %654 = vmatpush.bf16.msrb.mxu2 %v873_v7  ;;  %v198_v5 = vpop.f32.mrf.mxu0  ;;  %v619_v7 = vunpack.c.l.b16 %v1079_v56 }
  0xaf   :  { %641 = vmatpush.bf16.msrb.mxu1 %v878_v8  ;;  %667 = vmatpush.bf16.msrb.mxu3 %v878_v8  ;;  %v211_v6 = vpop.f32.mrf.mxu1  ;;  %v244_v29 = vpop.f32.mrf.mxu3  ;;  %v620_v8 = vunpack.c.h.b16 %v1079_v56 }
  0xb0   :  { %v621_v31 = vpack.c.b16 %v619_v7, %v619_v7 }
  0xb1   :  { %v622_v32 = vpack.c.b16 %v620_v8, %v620_v8 }
  0xb2   :  { %629 = vmatpush.bf16.msrb.mxu0 %v887_v11  ;;  %655 = vmatpush.bf16.msrb.mxu2 %v887_v11  ;;  %v579_v11 = vld.sshfl [vmem:[#allocation1] sm:$0xff pattern:$0x73625140] }
  0xb3   :  { %642 = vmatpush.bf16.msrb.mxu1 %v892_v12  ;;  %668 = vmatpush.bf16.msrb.mxu3 %v892_v12  ;;  %v580_v12 = vld.sshfl [vmem:[#allocation1 + $0x8] sm:$0xff pattern:$0x73625140] }
  0xb6   :  { %630 = vmatpush.bf16.msrb.mxu0 %v901_v16  ;;  %656 = vmatpush.bf16.msrb.mxu2 %v901_v16  ;;  %v583_v16 = vpack.c.bf16 %v579_v11, %v579_v11 }
  0xb7   :  { %643 = vmatpush.bf16.msrb.mxu1 %v906_v17  ;;  %669 = vmatpush.bf16.msrb.mxu3 %v906_v17  ;;  %v584_v17 = vpack.c.bf16 %v580_v12, %v580_v12 }
  0xba   :  { %631 = vmatpush.bf16.msrb.mxu0 %v916_v21  ;;  %657 = vmatpush.bf16.msrb.mxu2 %v916_v21  ;;  %v230_v21 = vadd.f32 %v229_v26, %v210_v30 }
  0xbb   :  { %644 = vmatpush.bf16.msrb.mxu1 %v921_v22  ;;  %670 = vmatpush.bf16.msrb.mxu3 %v921_v22 }
  0xbc   :  { %v243_v22 = vadd.f32 %v242_v27, %v230_v21 }
  0xbe   :  { %632 = vmatpush.bf16.msrb.mxu0 %v930_v23  ;;  %658 = vmatpush.bf16.msrb.mxu2 %v930_v23  ;;  %v255_v33 = vpop.f32.mrf.mxu0 }
  0xbf   :  { %645 = vmatpush.bf16.msrb.mxu1 %v935_v24  ;;  %671 = vmatpush.bf16.msrb.mxu3 %v935_v24 }
  0xc1   :  { %633 = vmatmul.bf16.vlgmr.msrb.gmra.mxu0 %v621_v31  ;;  %659 = vmatmul.bf16.vlgmr.msrb.gmra.mxu2 %v583_v16  ;;  %v268_v34 = vpop.f32.mrf.mxu1  ;;  %v810_v31 = vmov 0.0  }
  0xc2   :  { %646 = vmatmul.bf16.vlgmr.msrb.gmra.mxu1 %v622_v32  ;;  %672 = vmatmul.bf16.vlgmr.msrb.gmra.mxu3 %v584_v17  ;;  %v269_v35 = vadd.f32 %v268_v34, %v255_v33  ;;  %683 = vst [vmem:[#allocation2 + $0x4] sm:$0xf] %v810_v31 }
  0xc4   :  { %v272_v36 = vadd.f32 %v269_v35, %v243_v22 }
  0xc6   :  { %274 = vst.msk [vmem:[#allocation2] sm:$0x3] %vm273_vm1, %v272_v36  ;;  %v257_v37 = vpop.f32.mrf.mxu0 }
  0xc9   :  { %v270_v38 = vpop.f32.mrf.mxu1 }
  0xd0   :  { %v330_v39 = vpop.f32.mrf.mxu2  ;;  %v343_v40 = vpop.f32.mrf.mxu3 }
  0xd1   :  { %v344_v23 = vadd.f32 %v343_v40, %v330_v39 }
  0xd8   :  { %v332_v41 = vpop.f32.mrf.mxu2  ;;  %v345_v24 = vpop.f32.mrf.mxu3 }
  0xde   :  { %v363_v42 = vpop.f32.mrf.mxu0 }
  0xdf   :  { %v364_v44 = vadd.f32 %v363_v42, %v344_v23 }
  0xe1   :  { %v376_v43 = vpop.f32.mrf.mxu1 }
  0xe2   :  { %v377_v45 = vadd.f32 %v376_v43, %v364_v44 }
  0xe4   :  { %v389_v46 = vpop.f32.mrf.mxu2 }
  0xe6   :  { %v365_v49 = vpop.f32.mrf.mxu0 }
  0xe7   :  { %v402_v47 = vpop.f32.mrf.mxu3 }
  0xe8   :  { %v403_v48 = vadd.f32 %v402_v47, %v389_v46 }
  0xe9   :  { %v378_v50 = vpop.f32.mrf.mxu1 }
  0xea   :  { %v406_v51 = vadd.f32 %v403_v48, %v377_v45 }
  0xec   :  { %408 = vrot.lane.b32.xlu0 %v406_v51, %s809_s0  ;;  %v391_v52 = vpop.f32.mrf.mxu2 }
  0xef   :  { %v404_v53 = vpop.f32.mrf.mxu3 }
  0xfe   :  { %v468_v54 = vpop.f32.mrf.mxu0 }
 0x101   :  { %v481_v55 = vpop.f32.mrf.mxu1 }
 0x102   :  { %v482_v62 = vadd.f32 %v481_v55, %v468_v54 }
 0x104   :  { %v501_v56 = vpop.f32.mrf.mxu2 }
 0x105   :  { %v502_v63 = vadd.f32 %v501_v56, %v482_v62 }
 0x106   :  { %v470_v58 = vpop.f32.mrf.mxu0 }
 0x107   :  { %v514_v57 = vpop.f32.mrf.mxu3 }
 0x108   :  { %v515_v4 = vadd.f32 %v514_v57, %v502_v63 }
 0x109   :  { %v483_v59 = vpop.f32.mrf.mxu1 }
 0x10c   :  { %v503_v60 = vpop.f32.mrf.mxu2 }
 0x10f   :  { %v516_v61 = vpop.f32.mrf.mxu3 }
 0x11e   :  { %v527_v9 = vpop.f32.mrf.mxu0 }
 0x121   :  { %v540_v10 = vpop.f32.mrf.mxu1 }
 0x122   :  { %v541_v13 = vadd.f32 %v540_v10, %v527_v9 }
 0x124   :  { %v544_v14 = vadd.f32 %v541_v13, %v515_v4 }
 0x126   :  { %545 = vst.msk [vmem:[#allocation2 + $0x2] sm:$0x3] %vm273_vm1, %v544_v14  ;;  %v529_v15 = vpop.f32.mrf.mxu0 }
 0x127   :  { %v614_v1 = vpop.f32.mrf.mxu3 }
 0x128   :  { %v601_v0 = vpop.f32.mrf.mxu2 }
 0x129   :  { %v542_v18 = vpop.f32.mrf.mxu1  ;;  %v615_v25 = vadd.f32 %v614_v1, %v601_v0 }
 0x12f   :  { %v616_v20 = vpop.f32.mrf.mxu3 }
 0x130   :  { %v603_v19 = vpop.f32.mrf.mxu2 }
 0x13e   :  { %v634_v2 = vpop.f32.mrf.mxu0 }
 0x13f   :  { %v647_v3 = vpop.f32.mrf.mxu1  ;;  %v635_v26 = vadd.f32 %v634_v2, %v615_v25 }
 0x141   :  { %v648_v6 = vadd.f32 %v647_v3, %v635_v26 }
 0x144   :  { %v660_v27 = vpop.f32.mrf.mxu2 }
 0x145   :  { %v673_v5 = vpop.f32.mrf.mxu3 }
 0x146   :  { %v674_v28 = vadd.f32 %v673_v5, %v660_v27  ;;  %v636_v29 = vpop.f32.mrf.mxu0 }
 0x147   :  { %v649_v7 = vpop.f32.mrf.mxu1 }
 0x148   :  { %v677_v8 = vadd.f32 %v674_v28, %v648_v6 }
 0x14a   :  { %679 = vrot.lane.b32.xlu0 %v677_v8, %s809_s0 }
 0x14c   :  { %v662_v11 = vpop.f32.mrf.mxu2 }
 0x14d   :  { %v675_v12 = vpop.f32.mrf.mxu3 }
 0x15e   :  { %v409_v30 = vpop.permute.xlu0 %408 }
 0x15f   :  { %412 = vst.msk [vmem:[#allocation2] sm:$0x3] %vm411_vm2, %v409_v30 }
 0x1bc   :  { %v680_v32 = vpop.permute.xlu0 %679 }
 0x1bd   :  { %682 = vst.msk [vmem:[#allocation2 + $0x2] sm:$0x3] %vm411_vm2, %v680_v32 }
 0x1be   :  { %694 = dma.vmem_to_hbm [thread:$0]  %s690_s21, 128, %s692_s24, [#allocation3]  }
 0x1bf   :  { %807 = dma.done.wait [#allocation3], 128  }
 0x1c0   :  { %808 = vsyncadd [#allocation3], 4294967168 }
 0x1c1   :  { %699 = vsyncpa [#allocation3], 1 }

</bundles_post_ra>
